<compile_context>
chip_gen: v7x
topology: tpu7x:2x2x1
jax: 0.10.0
libtpu: 0.0.40
codegen_flags: <defaults>
</compile_context>

<pallas_src>
import jax
import jax.numpy as jnp
from jax.experimental import pallas as pl
from jax.experimental.pallas import tpu as pltpu

_MAX_DMA_CHUNKS = 4                    # max concurrent HBM->HBM DMAs
_MIN_CHUNK_BYTES = 4 * 1024 * 1024     # don't split below ~4 MiB per chunk
_MIN_KERNEL_BYTES = 1 * 1024 * 1024    # below this, skip the kernel entirely


def _sublane_align(dtype) -> int:
    """Second-minor packed-tile row multiple for this dtype (8/16/32)."""
    itemsize = jnp.dtype(dtype).itemsize
    packing = max(1, 4 // itemsize)    # 1 for f32, 2 for bf16/f16, 4 for int8/fp8
    return 8 * packing


def _chunk_bounds(d0: int, total_bytes: int, align: int):
    """Static, tile-aligned chunk boundaries [0, ..., d0] along the row axis.

    The number of chunks is size-aware: enough to keep several DMA engines
    busy, but never so many that per-descriptor setup stops being amortized.
    """
    n_by_size = max(1, -(-total_bytes // _MIN_CHUNK_BYTES))  # ceil-div
    n = max(1, min(_MAX_DMA_CHUNKS, n_by_size, d0))
    bounds = [0]
    for i in range(1, n):
        b = ((i * d0) // n // align) * align
        if b > bounds[-1]:
            bounds.append(b)
    bounds.append(d0)  # strictly greater than bounds[-1] since all b < d0
    return bounds


def _make_copy_kernel(bounds):
    """Kernel: start all HBM->HBM chunk DMAs, then wait on all of them."""
    n_chunks = len(bounds) - 1

    def kernel(x_hbm, o_hbm, sems):
        copies = []
        for c in range(n_chunks):  # static Python loop -> static slices
            start = bounds[c]
            size = bounds[c + 1] - bounds[c]
            cp = pltpu.make_async_copy(
                x_hbm.at[pl.ds(start, size)],
                o_hbm.at[pl.ds(start, size)],
                sems.at[c],
            )
            cp.start()
            copies.append(cp)
        for cp in copies:
            cp.wait()

    return kernel


def _identity_copy_2d(x2d: jax.Array) -> jax.Array:
    """Chunked HBM->HBM DMA copy of a 2-D array (no VMEM bounce)."""
    d0 = x2d.shape[0]
    total_bytes = x2d.size * x2d.dtype.itemsize
    bounds = _chunk_bounds(d0, total_bytes, _sublane_align(x2d.dtype))
    n_chunks = len(bounds) - 1

    return pl.pallas_call(
        _make_copy_kernel(bounds),
        out_shape=jax.ShapeDtypeStruct(x2d.shape, x2d.dtype),
        # Both operands stay in HBM; no auto-DMA / VMEM buffers at all.
        in_specs=[pl.BlockSpec(memory_space=pl.ANY)],
        out_specs=pl.BlockSpec(memory_space=pl.ANY),
        scratch_shapes=[pltpu.SemaphoreType.DMA((n_chunks,))],
        cost_estimate=pl.CostEstimate(
            flops=0, transcendentals=0, bytes_accessed=2 * total_bytes),
    )(x2d)


def _alias_kernel(x_hbm, o_hbm, flag):
    # Output buffer is aliased onto the input buffer; there is nothing to
    # move.  Write one scalar to SMEM scratch so the body is non-empty and
    # (with has_side_effects) cannot be dead-code-eliminated.
    flag[0] = jnp.int32(1)


def _identity_donated(x: jax.Array) -> jax.Array:
    """Zero-copy identity: output aliases the input buffer."""
    return pl.pallas_call(
        _alias_kernel,
        out_shape=jax.ShapeDtypeStruct(x.shape, x.dtype),
        in_specs=[pl.BlockSpec(memory_space=pl.ANY)],
        out_specs=pl.BlockSpec(memory_space=pl.ANY),
        scratch_shapes=[pltpu.SMEM((1,), jnp.int32)],
        input_output_aliases={0: 0},
        compiler_params=pltpu.CompilerParams(has_side_effects=True),
    )(x)


def dummy_transformer_block(x: jax.Array, *, donate: bool = False) -> jax.Array:
    """Identity forward pass of DummyTransformerBlock.

    donate=True: output aliases the input buffer (zero HBM traffic when the
    caller donates x, e.g. via jax.jit(..., donate_argnums=0)).
    donate=False: returns x directly for small tensors; otherwise makes a
    fresh buffer via a chunked HBM->HBM DMA copy kernel.
    """
    if x.ndim == 0 or x.size == 0:
        return x

    if donate:
        return _identity_donated(x)

    total_bytes = x.size * x.dtype.itemsize
    if total_bytes < _MIN_KERNEL_BYTES:
        # Launch overhead would dominate; PyTorch returns the same tensor
        # object anyway, so hand x back untouched (zero HBM traffic).
        return x

    # Flatten leading axes so the row axis has enough extent for multiple
    # DMAs in flight regardless of batch size (metadata-only for a
    # contiguous row-major array).
    if x.ndim >= 2:
        x2d = x.reshape(-1, x.shape[-1])
    else:
        x2d = x.reshape(1, x.size)
    y2d = _identity_copy_2d(x2d)
    return y2d.reshape(x.shape)


if __name__ == "__main__":
    # DummyTransformerBlock.__init__ takes a cfg but defines no parameters,
    # so there is nothing to initialize.
    key = jax.random.PRNGKey(0)
    k1, k2, k3 = jax.random.split(key, 3)

    # 1) Canonical small shape (batch=2, seq=8, hidden=32): below the kernel
    #    threshold -> zero-cost identity (same semantics as PyTorch's return x).
    x_small = jax.random.normal(k1, (2, 8, 32), dtype=jnp.float32)
    y_small = dummy_transformer_block(x_small)
    jax.block_until_ready(y_small)
    assert y_small.shape == x_small.shape and y_small.dtype == x_small.dtype
    assert bool(jnp.array_equal(y_small, x_small))

    # 2) Large enough to exercise the chunked HBM->HBM DMA copy kernel
    #    (8 MiB -> 2 chunks of ~4 MiB each, leading axes flattened).
    x_big = jax.random.normal(k2, (4, 512, 1024), dtype=jnp.float32)
    y_big = dummy_transformer_block(x_big)
    jax.block_until_ready(y_big)
    assert y_big.shape == x_big.shape and y_big.dtype == x_big.dtype
    assert bool(jnp.array_equal(y_big, x_big))

    # 3) Zero-copy aliased identity with buffer donation at the jit boundary.
    #    Compare against values regenerated from the same PRNG key since the
    #    donated input buffer must not be read after the call.
    x_don = jax.random.normal(k3, (256, 1024), dtype=jnp.float32)
    expected = jax.random.normal(k3, (256, 1024), dtype=jnp.float32)
    donated_fn = jax.jit(lambda a: dummy_transformer_block(a, donate=True),
                         donate_argnums=0)
    y_don = donated_fn(x_don)
    jax.block_until_ready(y_don)
    assert y_don.shape == expected.shape and y_don.dtype == expected.dtype
    assert bool(jnp.array_equal(y_don, expected))

    print("KERNEL_OK")
</pallas_src>

<mosaic_0001>
module attributes {stable_mosaic.version = 11 : i64} {
  func.func @kernel(%arg0: memref<2048x1024xf32, #tpu.memory_space<any>>, %arg1: memref<2048x1024xf32, #tpu.memory_space<any>>, %arg2: memref<2x!tpu.dma_semaphore, #tpu.memory_space<semaphore_mem>>) attributes {dimension_semantics = [], scalar_prefetch = 0 : i64, scratch_operands = 1 : i64, tpu.core_type = #tpu.core_type<tc>} {
    %c0_i32 = arith.constant 0 : i32
    %c0_i32_0 = arith.constant 0 : i32
    %c0_i32_1 = arith.constant 0 : i32
    %0 = tpu.memref_slice %arg0[%c0_i32_0, %c0_i32_1] : memref<2048x1024xf32, #tpu.memory_space<any>> -> memref<1024x1024xf32, #tpu.memory_space<any>>
    %c0_i32_2 = arith.constant 0 : i32
    %c0_i32_3 = arith.constant 0 : i32
    %1 = tpu.memref_slice %arg1[%c0_i32_2, %c0_i32_3] : memref<2048x1024xf32, #tpu.memory_space<any>> -> memref<1024x1024xf32, #tpu.memory_space<any>>
    %2 = tpu.memref_slice %arg2[%c0_i32] : memref<2x!tpu.dma_semaphore, #tpu.memory_space<semaphore_mem>> -> memref<1x!tpu.dma_semaphore, #tpu.memory_space<semaphore_mem>>
    %3 = tpu.memref_squeeze %2 : memref<1x!tpu.dma_semaphore, #tpu.memory_space<semaphore_mem>> -> memref<!tpu.dma_semaphore, #tpu.memory_space<semaphore_mem>>
    tpu.enqueue_dma source(%0 : memref<1024x1024xf32, #tpu.memory_space<any>>) target(%1 : memref<1024x1024xf32, #tpu.memory_space<any>>) target_semaphore(%3 : memref<!tpu.dma_semaphore, #tpu.memory_space<semaphore_mem>>)
    %c1_i32 = arith.constant 1 : i32
    %c1024_i32 = arith.constant 1024 : i32
    %c0_i32_4 = arith.constant 0 : i32
    %4 = tpu.memref_slice %arg0[%c1024_i32, %c0_i32_4] : memref<2048x1024xf32, #tpu.memory_space<any>> -> memref<1024x1024xf32, #tpu.memory_space<any>>
    %c1024_i32_5 = arith.constant 1024 : i32
    %c0_i32_6 = arith.constant 0 : i32
    %5 = tpu.memref_slice %arg1[%c1024_i32_5, %c0_i32_6] : memref<2048x1024xf32, #tpu.memory_space<any>> -> memref<1024x1024xf32, #tpu.memory_space<any>>
    %6 = tpu.memref_slice %arg2[%c1_i32] : memref<2x!tpu.dma_semaphore, #tpu.memory_space<semaphore_mem>> -> memref<1x!tpu.dma_semaphore, #tpu.memory_space<semaphore_mem>>
    %7 = tpu.memref_squeeze %6 : memref<1x!tpu.dma_semaphore, #tpu.memory_space<semaphore_mem>> -> memref<!tpu.dma_semaphore, #tpu.memory_space<semaphore_mem>>
    tpu.enqueue_dma source(%4 : memref<1024x1024xf32, #tpu.memory_space<any>>) target(%5 : memref<1024x1024xf32, #tpu.memory_space<any>>) target_semaphore(%7 : memref<!tpu.dma_semaphore, #tpu.memory_space<semaphore_mem>>)
    %c0_i32_7 = arith.constant 0 : i32
    %c0_i32_8 = arith.constant 0 : i32
    %c0_i32_9 = arith.constant 0 : i32
    %8 = tpu.memref_slice %arg0[%c0_i32_8, %c0_i32_9] : memref<2048x1024xf32, #tpu.memory_space<any>> -> memref<1024x1024xf32, #tpu.memory_space<any>>
    %c0_i32_10 = arith.constant 0 : i32
    %c0_i32_11 = arith.constant 0 : i32
    %9 = tpu.memref_slice %arg1[%c0_i32_10, %c0_i32_11] : memref<2048x1024xf32, #tpu.memory_space<any>> -> memref<1024x1024xf32, #tpu.memory_space<any>>
    %10 = tpu.memref_slice %arg2[%c0_i32_7] : memref<2x!tpu.dma_semaphore, #tpu.memory_space<semaphore_mem>> -> memref<1x!tpu.dma_semaphore, #tpu.memory_space<semaphore_mem>>
    %11 = tpu.memref_squeeze %10 : memref<1x!tpu.dma_semaphore, #tpu.memory_space<semaphore_mem>> -> memref<!tpu.dma_semaphore, #tpu.memory_space<semaphore_mem>>
    tpu.wait_dma2 semaphore(%11 : memref<!tpu.dma_semaphore, #tpu.memory_space<semaphore_mem>>) src(%8 : memref<1024x1024xf32, #tpu.memory_space<any>>) dst(%9 : memref<1024x1024xf32, #tpu.memory_space<any>>)
    %c1_i32_12 = arith.constant 1 : i32
    %c1024_i32_13 = arith.constant 1024 : i32
    %c0_i32_14 = arith.constant 0 : i32
    %12 = tpu.memref_slice %arg0[%c1024_i32_13, %c0_i32_14] : memref<2048x1024xf32, #tpu.memory_space<any>> -> memref<1024x1024xf32, #tpu.memory_space<any>>
    %c1024_i32_15 = arith.constant 1024 : i32
    %c0_i32_16 = arith.constant 0 : i32
    %13 = tpu.memref_slice %arg1[%c1024_i32_15, %c0_i32_16] : memref<2048x1024xf32, #tpu.memory_space<any>> -> memref<1024x1024xf32, #tpu.memory_space<any>>
    %14 = tpu.memref_slice %arg2[%c1_i32_12] : memref<2x!tpu.dma_semaphore, #tpu.memory_space<semaphore_mem>> -> memref<1x!tpu.dma_semaphore, #tpu.memory_space<semaphore_mem>>
    %15 = tpu.memref_squeeze %14 : memref<1x!tpu.dma_semaphore, #tpu.memory_space<semaphore_mem>> -> memref<!tpu.dma_semaphore, #tpu.memory_space<semaphore_mem>>
    tpu.wait_dma2 semaphore(%15 : memref<!tpu.dma_semaphore, #tpu.memory_space<semaphore_mem>>) src(%12 : memref<1024x1024xf32, #tpu.memory_space<any>>) dst(%13 : memref<1024x1024xf32, #tpu.memory_space<any>>)
    return
  }
}

</mosaic_0001>

<bundles_post_ra>
// kernel: tpu_custom_call.1
= control target key start
LH: loop header
LB: loop body
LE: loop exit
PB: predicated region body
PF: predicated region fallthrough
CT: control target
= control target key end

     0   :  { %s65_s9 = smov [#allocation2]   ;;  %s66_s10 = smov [#allocation3]   ;;  %s92_s0 = inlined_call_operand.hbm [shape: f32[2048,1024], index: 0, kind: input, shape index: {}]   ;;  %s93_s1 = inlined_call_operand.hbm [shape: f32[2048,1024], index: 1, kind: output, shape index: {}]  }
   0x1   :  { %s19_s8 = scalar_lea.hbm %s92_s0, 131072  ;;  %s67_s11 = smov 0  }
   0x2   :  { %18 = dma.general %s92_s0, 131072, %s93_s1, %s65_s9, %s66_s10, [#allocation4], %s67_s11, 0  }
   0x3   :  { %s20_s18 = scalar_lea.hbm %s93_s1, 131072  ;;  %s68_s19 = smov [#allocation2 + $0x1]  }
   0x4   :  { %s69_s20 = smov [#allocation5]  }
   0x5   :  { %34 = dma.general %s19_s8, 131072, %s20_s18, %s68_s19, %s69_s20, [#allocation6], %s67_s11, 0  }
   0x6   :  { %61 = dma.done.wait [#allocation2], 131072 }
   0x7   :  { %62 = vsyncadd [#allocation2], 4294836224 }
   0x8   :  { %63 = dma.done.wait [#allocation2 + $0x1], 131072 }
   0x9   :  { %64 = vsyncadd [#allocation2 + $0x1], 4294836224 }
   0xa   :  { %41 = vsyncmov [#allocation2] }
   0xd   :  { %s42_s21 = vpop.sfrf %41 }
   0xe   :  { %p54_p0 = scmp.ne.s32.totalorder %s42_s21, 0 }
  0x10   :  { %46 = shalt.err (%p54_p0)  }
  0x11   :  { %48 = vsyncmov [#allocation2 + $0x1] }
  0x14   :  { %s49_s22 = vpop.sfrf %48 }
  0x15   :  { %p55_p1 = scmp.ne.s32.totalorder %s49_s22, 0 }
  0x17   :  { %53 = shalt.err (%p55_p1)  }

</bundles_post_ra>
